<compile_context>
chip_gen: v7x
topology: tpu7x:2x2x1
jax: 0.10.0
libtpu: 0.0.40
codegen_flags: <defaults>
</compile_context>

<pallas_src>
import functools

import jax
import jax.numpy as jnp
from jax.experimental import pallas as pl
from jax.experimental.pallas import tpu as pltpu


def _round_up(x, n):
    return ((x + n - 1) // n) * n


def _triplet_kernel(head_ref, edge_ref, end_ref, w_ref, b_ref, o_ref):
    # Three MXU dots against the three (D, Dp) planes of W^T; f32 accumulation.
    acc = jnp.dot(head_ref[...], w_ref[0], preferred_element_type=jnp.float32)
    acc = acc + jnp.dot(edge_ref[...], w_ref[1],
                        preferred_element_type=jnp.float32)
    acc = acc + jnp.dot(end_ref[...], w_ref[2],
                        preferred_element_type=jnp.float32)
    # Bias (f32) + ReLU, cast to output dtype.  The output lane dim is padded
    # to a multiple of 128, so this store is an unmasked, lane-dense vst.
    o_ref[...] = jnp.maximum(acc + b_ref[...], 0.0).astype(o_ref.dtype)


def prepare_in_proj(weight, bias, compute_dtype=jnp.bfloat16):
    """Prepare nn.Linear(3D, D) params once (hoist out of the hot loop).

    weight: (D, 3D) PyTorch layout; bias: (D,).
    Returns:
      w_t: (3, D, Dp)  W^T split into head/edge/end planes, cast to
           compute_dtype, output dim zero-padded to Dp
      b  : (1, Dp)     f32 bias, zero-padded
    where Dp = D rounded up to a multiple of 128 (lane-dense output stores).
    """
    d = weight.shape[0]
    dp = _round_up(d, 128)
    w_t = weight.T.astype(compute_dtype)            # (3D, D)
    b = bias.astype(jnp.float32)
    if dp != d:
        w_t = jnp.pad(w_t, ((0, 0), (0, dp - d)))   # zero cols -> zero outputs
        b = jnp.pad(b, (0, dp - d))
    # Rows [0:D) = head weights, [D:2D) = edge, [2D:3D) = end.
    w_t = w_t.reshape(3, d, dp)
    return w_t, b.reshape(1, dp)


@functools.partial(jax.jit, static_argnames=("tm", "compute_dtype"))
def triplet_embedding(head_h, edge_h, end_h, w_t, b, *, tm=None,
                      compute_dtype=jnp.bfloat16):
    """head_h/edge_h/end_h: (..., D); (w_t, b) come from prepare_in_proj."""
    d = head_h.shape[-1]
    dp = w_t.shape[-1]
    lead_shape = head_h.shape[:-1]
    out_dtype = head_h.dtype

    # Flatten leading dims -> rows; cast activations for the MXU (also halves
    # HBM read bytes for the three streamed inputs when compute_dtype is bf16).
    h2 = head_h.reshape(-1, d).astype(compute_dtype)
    e2 = edge_h.reshape(-1, d).astype(compute_dtype)
    t2 = end_h.reshape(-1, d).astype(compute_dtype)
    m = h2.shape[0]

    if tm is None:
        # Row tile: big enough to pipeline and keep the MXU fed (up to 512),
        # small enough that the double-buffered streams stay well inside the
        # default scoped VMEM limit on all generations (v7x: 64 MiB physical).
        in_b = jnp.dtype(compute_dtype).itemsize
        out_b = jnp.dtype(out_dtype).itemsize
        per_row = 2 * (3 * d * in_b + dp * out_b)     # 2x = double buffering
        budget = 16 << 20                             # headroom for W^T, bias, spills
        tm = max(8, min(512, budget // max(per_row, 1)))
        tm = (tm // 8) * 8
    tm = min(tm, _round_up(m, 8))                     # don't over-tile tiny M

    grid_spec = pl.GridSpec(
        grid=(pl.cdiv(m, tm),),
        in_specs=[
            pl.BlockSpec((tm, d), lambda i: (i, 0)),         # head rows (streamed)
            pl.BlockSpec((tm, d), lambda i: (i, 0)),         # edge rows (streamed)
            pl.BlockSpec((tm, d), lambda i: (i, 0)),         # end rows  (streamed)
            pl.BlockSpec((3, d, dp), lambda i: (0, 0, 0)),   # W^T planes (VMEM-resident)
            pl.BlockSpec((1, dp), lambda i: (0, 0)),         # bias (VMEM-resident)
        ],
        out_specs=pl.BlockSpec((tm, dp), lambda i: (i, 0)),
    )

    out = pl.pallas_call(
        _triplet_kernel,
        out_shape=jax.ShapeDtypeStruct((m, dp), out_dtype),
        grid_spec=grid_spec,
        compiler_params=pltpu.CompilerParams(
            dimension_semantics=("parallel",)),
    )(h2, e2, t2, w_t, b)

    if dp != d:
        out = out[:, :d]                              # drop lane padding
    return out.reshape(*lead_shape, d)


def _reference(head_h, edge_h, end_h, weight, bias, compute_dtype=None):
    """Pure-JAX reference. Optional compute_dtype mimics the bf16 matmul path."""
    if compute_dtype is not None:
        head_h = head_h.astype(compute_dtype)
        edge_h = edge_h.astype(compute_dtype)
        end_h = end_h.astype(compute_dtype)
        weight = weight.astype(compute_dtype)
    x = jnp.concatenate([head_h, edge_h, end_h], axis=-1)
    y = jnp.dot(x, weight.T, preferred_element_type=jnp.float32) + bias
    return jnp.maximum(y, 0.0)


if __name__ == "__main__":
    B, S, D = 2, 8, 32  # batch, seq, d_hidden

    key = jax.random.PRNGKey(0)
    k_head, k_edge, k_end, k_w, k_b = jax.random.split(key, 5)

    head_h = jax.random.normal(k_head, (B, S, D), dtype=jnp.float32)
    edge_h = jax.random.normal(k_edge, (B, S, D), dtype=jnp.float32)
    end_h = jax.random.normal(k_end, (B, S, D), dtype=jnp.float32)

    # nn.Linear(3*D, D): weight (D, 3*D), bias (D,) — deterministic synthetic init.
    bound = 1.0 / (3.0 * D) ** 0.5
    weight = jax.random.uniform(k_w, (D, 3 * D), jnp.float32, -bound, bound)
    bias = jax.random.uniform(k_b, (D,), jnp.float32, -bound, bound)

    ref_f32 = _reference(head_h, edge_h, end_h, weight, bias)
    ref_bf16 = _reference(head_h, edge_h, end_h, weight, bias,
                          compute_dtype=jnp.bfloat16)

    # 1) Default fast path: bf16 matmul, f32 accumulate, auto row tile.
    w_bf, b_bf = prepare_in_proj(weight, bias)                     # bf16 W^T
    out_bf = jax.block_until_ready(
        triplet_embedding(head_h, edge_h, end_h, w_bf, b_bf))
    assert out_bf.shape == (B, S, D)
    assert jnp.allclose(out_bf, ref_bf16, atol=2e-3, rtol=2e-3), \
        "bf16 path mismatch vs bf16-cast reference"
    assert jnp.allclose(out_bf, ref_f32, atol=5e-2, rtol=5e-2), \
        "bf16 path mismatch vs f32 reference"

    # 2) f32 compute path with an explicit small row tile -> multi-step grid,
    #    exercising the pipelined / multi-tile code path.
    w_32, b_32 = prepare_in_proj(weight, bias, compute_dtype=jnp.float32)
    out_32 = jax.block_until_ready(
        triplet_embedding(head_h, edge_h, end_h, w_32, b_32,
                          tm=8, compute_dtype=jnp.float32))
    assert out_32.shape == (B, S, D)
    # Loose-ish tolerance: TPU default f32 matmul precision (MXU passes) can
    # differ slightly between the split-K kernel and XLA's single dot.
    assert jnp.allclose(out_32, ref_f32, atol=2e-2, rtol=2e-2), \
        "f32 path mismatch vs reference"

    print("KERNEL_OK")
</pallas_src>

<mosaic_0001>
module attributes {stable_mosaic.version = 11 : i64} {
  func.func @_triplet_kernel(%arg0: i32, %arg1: memref<16x32xbf16, #tpu.memory_space<vmem>>, %arg2: memref<16x32xbf16, #tpu.memory_space<vmem>>, %arg3: memref<16x32xbf16, #tpu.memory_space<vmem>>, %arg4: memref<3x32x128xbf16, #tpu.memory_space<vmem>>, %arg5: memref<1x128xf32, #tpu.memory_space<vmem>>, %arg6: memref<16x128xf32, #tpu.memory_space<vmem>>) attributes {dimension_semantics = [#tpu.dimension_semantics<parallel>], iteration_bounds = array<i64: 1>, scalar_prefetch = 0 : i64, scratch_operands = 0 : i64, tpu.core_type = #tpu.core_type<tc>, window_params = [{transform_indices = @transform_0, window_bounds = array<i64: 16, 32>}, {transform_indices = @transform_1, window_bounds = array<i64: 16, 32>}, {transform_indices = @transform_2, window_bounds = array<i64: 16, 32>}, {pipeline_mode = #tpu.pipeline_mode<synchronous>, transform_indices = @transform_3, window_bounds = array<i64: 3, 32, 128>}, {pipeline_mode = #tpu.pipeline_mode<synchronous>, transform_indices = @transform_4, window_bounds = array<i64: 1, 128>}, {transform_indices = @transform_5, window_bounds = array<i64: 16, 128>}]} {
    %c0 = arith.constant 0 : index
    %c0_0 = arith.constant 0 : index
    %0 = vector.load %arg1[%c0, %c0_0] : memref<16x32xbf16, #tpu.memory_space<vmem>>, vector<16x32xbf16>
    %c0_1 = arith.constant 0 : index
    %c0_2 = arith.constant 0 : index
    %c0_3 = arith.constant 0 : index
    %1 = vector.load %arg4[%c0_1, %c0_2, %c0_3] : memref<3x32x128xbf16, #tpu.memory_space<vmem>>, vector<1x32x128xbf16>
    %2 = vector.shape_cast %1 : vector<1x32x128xbf16> to vector<32x128xbf16>
    %cst = arith.constant dense<0.000000e+00> : vector<16x128xf32>
    %3 = tpu.matmul %0, %2, %cst {dimension_numbers = #tpu.dot_dimension_numbers<[1], [0], [0], [1], [0, 0, 1, 1], [], []>} : vector<16x32xbf16>, vector<32x128xbf16>, vector<16x128xf32> -> vector<16x128xf32>
    %c0_4 = arith.constant 0 : index
    %c0_5 = arith.constant 0 : index
    %4 = vector.load %arg2[%c0_4, %c0_5] : memref<16x32xbf16, #tpu.memory_space<vmem>>, vector<16x32xbf16>
    %c1 = arith.constant 1 : index
    %c0_6 = arith.constant 0 : index
    %c0_7 = arith.constant 0 : index
    %5 = vector.load %arg4[%c1, %c0_6, %c0_7] : memref<3x32x128xbf16, #tpu.memory_space<vmem>>, vector<1x32x128xbf16>
    %6 = vector.shape_cast %5 : vector<1x32x128xbf16> to vector<32x128xbf16>
    %cst_8 = arith.constant dense<0.000000e+00> : vector<16x128xf32>
    %7 = tpu.matmul %4, %6, %cst_8 {dimension_numbers = #tpu.dot_dimension_numbers<[1], [0], [0], [1], [0, 0, 1, 1], [], []>} : vector<16x32xbf16>, vector<32x128xbf16>, vector<16x128xf32> -> vector<16x128xf32>
    %8 = arith.addf %3, %7 : vector<16x128xf32>
    %c0_9 = arith.constant 0 : index
    %c0_10 = arith.constant 0 : index
    %9 = vector.load %arg3[%c0_9, %c0_10] : memref<16x32xbf16, #tpu.memory_space<vmem>>, vector<16x32xbf16>
    %c2 = arith.constant 2 : index
    %c0_11 = arith.constant 0 : index
    %c0_12 = arith.constant 0 : index
    %10 = vector.load %arg4[%c2, %c0_11, %c0_12] : memref<3x32x128xbf16, #tpu.memory_space<vmem>>, vector<1x32x128xbf16>
    %11 = vector.shape_cast %10 : vector<1x32x128xbf16> to vector<32x128xbf16>
    %cst_13 = arith.constant dense<0.000000e+00> : vector<16x128xf32>
    %12 = tpu.matmul %9, %11, %cst_13 {dimension_numbers = #tpu.dot_dimension_numbers<[1], [0], [0], [1], [0, 0, 1, 1], [], []>} : vector<16x32xbf16>, vector<32x128xbf16>, vector<16x128xf32> -> vector<16x128xf32>
    %13 = arith.addf %8, %12 : vector<16x128xf32>
    %c0_14 = arith.constant 0 : index
    %c0_15 = arith.constant 0 : index
    %14 = vector.load %arg5[%c0_14, %c0_15] : memref<1x128xf32, #tpu.memory_space<vmem>>, vector<1x128xf32>
    %15 = vector.broadcast %14 : vector<1x128xf32> to vector<16x128xf32>
    %16 = arith.addf %13, %15 : vector<16x128xf32>
    %cst_16 = arith.constant 0.000000e+00 : f32
    %17 = vector.broadcast %cst_16 : f32 to vector<16x128xf32>
    %18 = arith.maximumf %16, %17 : vector<16x128xf32>
    %c0_17 = arith.constant 0 : index
    %c0_18 = arith.constant 0 : index
    %19 = vector.load %arg6[%c0_17, %c0_18] : memref<16x128xf32, #tpu.memory_space<vmem>>, vector<16x128xf32>
    tpu.vector_store %arg6[%c0_17, %c0_18], %18 {strides = array<i32>} : memref<16x128xf32, #tpu.memory_space<vmem>>, vector<16x128xf32>,
    return
  }
  func.func @transform_0(%arg0: i32) -> (i32, i32) {
    %c0_i32 = arith.constant 0 : i32
    %c0_i32_0 = arith.constant 0 : i32
    return %arg0, %c0_i32 : i32, i32
  }
  func.func @transform_1(%arg0: i32) -> (i32, i32) {
    %c0_i32 = arith.constant 0 : i32
    %c0_i32_0 = arith.constant 0 : i32
    return %arg0, %c0_i32 : i32, i32
  }
  func.func @transform_2(%arg0: i32) -> (i32, i32) {
    %c0_i32 = arith.constant 0 : i32
    %c0_i32_0 = arith.constant 0 : i32
    return %arg0, %c0_i32 : i32, i32
  }
  func.func @transform_3(%arg0: i32) -> (i32, i32, i32) {
    %c0_i32 = arith.constant 0 : i32
    %c0_i32_0 = arith.constant 0 : i32
    %c0_i32_1 = arith.constant 0 : i32
    %c0_i32_2 = arith.constant 0 : i32
    return %c0_i32, %c0_i32_0, %c0_i32_1 : i32, i32, i32
  }
  func.func @transform_4(%arg0: i32) -> (i32, i32) {
    %c0_i32 = arith.constant 0 : i32
    %c0_i32_0 = arith.constant 0 : i32
    %c0_i32_1 = arith.constant 0 : i32
    return %c0_i32, %c0_i32_0 : i32, i32
  }
  func.func @transform_5(%arg0: i32) -> (i32, i32) {
    %c0_i32 = arith.constant 0 : i32
    %c0_i32_0 = arith.constant 0 : i32
    return %arg0, %c0_i32 : i32, i32
  }
}

</mosaic_0001>

<bundles_post_ra>
// kernel: triplet_embedding.1
= control target key start
LH: loop header
LB: loop body
LE: loop exit
PB: predicated region body
PF: predicated region fallthrough
CT: control target
= control target key end

     0   :  { %v309_v0 = vmov 0.0   ;;  %vm310_vm0 = vmmov 0   ;;  %vm51_vm1 = vcmask 261120   ;;  %s380_s3 = inlined_call_operand.vmem [shape: bf16[3,32,128], index: 3, kind: input, shape index: {}]   ;;  %s381_s1 = inlined_call_operand.vmem [shape: bf16[16,32], index: 1, kind: input, shape index: {}]   ;;  %s382_s0 = inlined_call_operand.vmem [shape: bf16[16,32], index: 0, kind: input, shape index: {}]   ;;  %s383_s2 = inlined_call_operand.vmem [shape: bf16[16,32], index: 2, kind: input, shape index: {}]   ;;  %s384_s4 = inlined_call_operand.vmem [shape: f32[1,128], index: 4, kind: input, shape index: {}]   ;;  %s385_s5 = inlined_call_operand.vmem [shape: f32[16,128], index: 5, kind: output, shape index: {}]  }
   0x1   :  { %274 = vmatprep.subr.bf16.mxu0 %v309_v0  ;;  %282 = vmatprep.subr.bf16.mxu1 %v309_v0  ;;  %v300_v1 = vld [vmem:[%s380_s3 + $0x10] sm:$0xff]   ;;  %v301_v2 = vld [vmem:[%s380_s3] sm:$0xff]   ;;  %v302_v3 = vld [vmem:[%s380_s3 + $0x18] sm:$0xff]  }
   0x2   :  { %278 = vmatprep.mubr.msk.bf16.mxu0 %vm310_vm0, %v309_v0  ;;  %286 = vmatprep.mubr.msk.bf16.mxu1 %vm310_vm0, %v309_v0  ;;  %v303_v4 = vld [vmem:[%s380_s3 + $0x8] sm:$0xff]   ;;  %v304_v5 = vld [vmem:[%s381_s1] sm:$0xff]  }
   0x3   :  { %275 = vmatpush3.bf16.msra.mxu0 %v300_v1  ;;  %283 = vmatpush3.bf16.msra.mxu1 %v301_v2  ;;  %v305_v6 = vld [vmem:[%s382_s0] sm:$0xff]   ;;  %v307_v8 = vld [vmem:[%s380_s3 + $0x28] sm:$0xff]  }
   0x4   :  { %276 = vmatprep.subr.bf16.mxu0 %v309_v0  ;;  %284 = vmatprep.subr.bf16.mxu1 %v309_v0  ;;  %v306_v7 = vld [vmem:[%s380_s3 + $0x20] sm:$0xff]  }
   0x5   :  { %v308_v9 = vld [vmem:[%s383_s2] sm:$0xff]  }
   0x6   :  { %v264_v21 = vld [vmem:[%s384_s4] ss:$0 sm:$0xff] }
   0x7   :  { %277 = vmatpush3.bf16.msra.mxu0 %v302_v3  ;;  %285 = vmatpush3.bf16.msra.mxu1 %v303_v4 }
   0x8   :  { %290 = vmatprep.subr.bf16.mxu0 %v309_v0 }
   0xa   :  { %279 = vmatmul.mubr.msk.bf16.vlgmr.msra.gmra.mrb[0].mxu0 %vm51_vm1, %v304_v5  ;;  %287 = vmatmul.mubr.msk.bf16.vlgmr.msra.gmra.mrb[0].mxu1 %vm51_vm1, %v305_v6 }
   0xb   :  { %291 = vmatpush3.bf16.msra.mxu0 %v306_v7  ;;  %294 = vmatprep.mubr.msk.bf16.mxu0 %vm310_vm0, %v309_v0 }
   0xc   :  { %292 = vmatprep.subr.bf16.mxu0 %v309_v0 }
   0xf   :  { %293 = vmatpush3.bf16.msra.mxu0 %v307_v8 }
  0x12   :  { %295 = vmatmul.mubr.msk.bf16.vlgmr.msra.gmra.mrb[4].mxu0 %vm51_vm1, %v308_v9 }
  0xdd   :  { %v89_v10 = vpop.f32.mrb[0].mxu0  ;;  %v150_v11 = vpop.f32.mrb[0].mxu1 }
  0xde   :  { %v280_v12 = vpop.f32.mrb[1].mxu0  ;;  %v151_v13 = vadd.f32 %v150_v11, %v89_v10  ;;  %v288_v14 = vpop.f32.mrb[1].mxu1 }
  0xdf   :  { %v92_v15 = vpop.f32.mrb[2].mxu0  ;;  %v153_v16 = vpop.f32.mrb[2].mxu1 }
  0xe0   :  { %v281_v17 = vpop.f32.mrb[3].mxu0  ;;  %v154_v18 = vadd.f32 %v153_v16, %v92_v15  ;;  %v289_v19 = vpop.f32.mrb[3].mxu1 }
  0xe5   :  { %v218_v20 = vpop.f32.mrb[4].mxu0 }
  0xe6   :  { %v225_v22 = vadd.f32 %v218_v20, %v151_v13  ;;  %v296_v23 = vpop.f32.mrb[5].mxu0 }
  0xe7   :  { %v221_v24 = vpop.f32.mrb[6].mxu0 }
  0xe8   :  { %v234_v25 = vadd.f32 %v264_v21, %v225_v22  ;;  %v226_v26 = vadd.f32 %v221_v24, %v154_v18  ;;  %v297_v27 = vpop.f32.mrb[7].mxu0 }
  0xea   :  { %v236_v28 = vmax.f32 %v234_v25, 0.0  ;;  %v235_v29 = vadd.f32 %v264_v21, %v226_v26 }
  0xec   :  { %238 = vst [vmem:[%s385_s5] sm:$0xff] %v236_v28  ;;  %v237_v30 = vmax.f32 %v235_v29, 0.0 }
  0xee   :  { %239 = vst [vmem:[%s385_s5 + $0x8] sm:$0xff] %v237_v30 }

</bundles_post_ra>
